<compile_context>
chip_gen: v6e
topology: v6e:2x2x1
jax: 0.10.0
libtpu: 0.0.40
codegen_flags: <defaults>
</compile_context>

<pallas_src>
import functools

import jax
import jax.numpy as jnp
from jax.experimental import pallas as pl
from jax.experimental.pallas import tpu as pltpu


# ------------------------------- kernels ------------------------------------

def _proj_kernel(x_ref, w_ref, y0_ref, y1_ref):
    """y = x @ [W1[0] | W1[1]]  -- one fused MXU matmul per row block."""
    hp = y0_ref.shape[-1]
    y = jnp.dot(x_ref[...], w_ref[...], preferred_element_type=jnp.float32)
    y0_ref[...] = y[:, :hp]                                # identity path (f32)
    y1_ref[...] = y[:, hp:].astype(jnp.bfloat16)           # Laplacian path (bf16)


def _layer1_kernel(l_ref, y0_ref, y1_ref, b1_ref, w2_ref, g0_ref, g1_ref):
    """h = relu(x@W1[0] + L@(x@W1[1]) + b1); then g = h @ [W2[0] | W2[1]]."""
    agg = jnp.dot(l_ref[...], y1_ref[...], preferred_element_type=jnp.float32)
    h = jnp.maximum(y0_ref[...] + agg + b1_ref[...], 0.0)      # f32 elementwise
    # TODO(synk): F.dropout(training=True) not implemented; eval = identity.
    cp = g0_ref.shape[-1]
    g = jnp.dot(h.astype(jnp.bfloat16), w2_ref[...],
                preferred_element_type=jnp.float32)
    g0_ref[...] = g[:, :cp]
    g1_ref[...] = g[:, cp:].astype(jnp.bfloat16)


def _layer2_kernel(l_ref, g0_ref, g1_ref, b2_ref, out_ref, *, num_classes):
    """logits = h@W2[0] + L@(h@W2[1]) + b2; masked log_softmax over class lanes."""
    agg = jnp.dot(l_ref[...], g1_ref[...], preferred_element_type=jnp.float32)
    logits = g0_ref[...] + agg + b2_ref[...]
    col = jax.lax.broadcasted_iota(jnp.int32, logits.shape, 1)
    logits = jnp.where(col < num_classes, logits, -1e30)   # mask lane padding
    m = jnp.max(logits, axis=-1, keepdims=True)
    z = logits - m
    lse = jnp.log(jnp.sum(jnp.exp(z), axis=-1, keepdims=True))
    out_ref[...] = z - lse


# ------------------------------- wrapper -------------------------------------

def _round_up(x, m):
    return ((x + m - 1) // m) * m


def _choose_tile(n):
    """Row-tile tm and padded node count, sized for a ~24 MiB VMEM budget (v7x-safe)."""
    n8 = _round_up(max(n, 8), 8)
    budget = 24 * 1024 * 1024
    for tm in (1024, 512, 256, 128, 64, 32, 16, 8):
        tm_eff = min(tm, n8)
        n_pad = _round_up(n8, tm_eff)
        l_bytes = 2 * tm_eff * n_pad * 2          # L row tile, bf16, double-buffered
        res_bytes = 2 * n_pad * 128 * 2           # resident projection (N, 128) bf16
        io_bytes = 2 * (tm_eff * 128 * 4 * 2      # y0/g0 tiles (f32)
                        + tm_eff * 128 * 2        # g1 tile (bf16)
                        + 128 * 256 * 2 + 128 * 4)  # stacked weights + bias
        if l_bytes + res_bytes + io_bytes <= budget:
            return tm_eff, n_pad
    return 8, _round_up(n8, 8)


def chebnet_forward(l_hat, x, params):
    n, f = x.shape
    k, _, h = params["w1"].shape
    c = params["w2"].shape[-1]
    assert k == 2, "ChebConv with K=2 expected"

    hp = _round_up(h, 128)          # lane-dense hidden width
    cp = _round_up(c, 128)          # lane-dense class width
    tm, n_pad = _choose_tile(n)
    grid = (n_pad // tm,)

    # ---- pack / pad / cast operands in the wrapper (layout plumbing only) ----
    l_p = jnp.zeros((n_pad, n_pad), jnp.bfloat16).at[:n, :n].set(
        l_hat.astype(jnp.bfloat16))
    x_p = jnp.zeros((n_pad, f), jnp.bfloat16).at[:n, :].set(x.astype(jnp.bfloat16))

    def pad_w(w, rows, cols):
        return jnp.zeros((rows, cols), jnp.bfloat16).at[
            :w.shape[0], :w.shape[1]].set(w.astype(jnp.bfloat16))

    w1s = jnp.concatenate([pad_w(params["w1"][0], f, hp),
                           pad_w(params["w1"][1], f, hp)], axis=1)    # (F, 2*Hp)
    w2s = jnp.concatenate([pad_w(params["w2"][0], hp, cp),
                           pad_w(params["w2"][1], hp, cp)], axis=1)   # (Hp, 2*Cp)
    b1p = jnp.zeros((1, hp), jnp.float32).at[0, :h].set(params["b1"])
    b2p = jnp.zeros((1, cp), jnp.float32).at[0, :c].set(params["b2"])

    cparams = pltpu.CompilerParams(
        dimension_semantics=("parallel",),
        vmem_limit_bytes=32 * 1024 * 1024)

    def row_blk(width):
        return pl.BlockSpec((tm, width), lambda i: (i, 0))

    def full_blk(shape):
        return pl.BlockSpec(shape, lambda i: (0, 0))

    # ---- stage 1: fused layer-1 projection  y = x @ [W1[0] | W1[1]] ----
    y0, y1 = pl.pallas_call(
        _proj_kernel,
        grid=grid,
        in_specs=[row_blk(f), full_blk((f, 2 * hp))],
        out_specs=(row_blk(hp), row_blk(hp)),
        out_shape=(jax.ShapeDtypeStruct((n_pad, hp), jnp.float32),
                   jax.ShapeDtypeStruct((n_pad, hp), jnp.bfloat16)),
        compiler_params=cparams,
    )(x_p, w1s)

    # ---- stage 2: h = relu(y0 + L @ y1 + b1); fused layer-2 projection ----
    g0, g1 = pl.pallas_call(
        _layer1_kernel,
        grid=grid,
        in_specs=[row_blk(n_pad), row_blk(hp), full_blk((n_pad, hp)),
                  full_blk((1, hp)), full_blk((hp, 2 * cp))],
        out_specs=(row_blk(cp), row_blk(cp)),
        out_shape=(jax.ShapeDtypeStruct((n_pad, cp), jnp.float32),
                   jax.ShapeDtypeStruct((n_pad, cp), jnp.bfloat16)),
        compiler_params=cparams,
    )(l_p, y0, y1, b1p, w2s)

    # ---- stage 3: logits = g0 + L @ g1 + b2; log_softmax over classes ----
    out = pl.pallas_call(
        functools.partial(_layer2_kernel, num_classes=c),
        grid=grid,
        in_specs=[row_blk(n_pad), row_blk(cp), full_blk((n_pad, cp)),
                  full_blk((1, cp))],
        out_specs=row_blk(cp),
        out_shape=jax.ShapeDtypeStruct((n_pad, cp), jnp.float32),
        compiler_params=cparams,
    )(l_p, g0, g1, b2p)

    return out[:n, :c]


# ----------------------------- plain-JAX glue --------------------------------

def build_scaled_laplacian(edge_index, edge_weight, num_nodes):
    """Dense L_hat = -D^{-1/2} A D^{-1/2} (ChebConv 'sym' norm, lambda_max=2)."""
    src, dst = edge_index[0], edge_index[1]
    adj = jnp.zeros((num_nodes, num_nodes), jnp.float32)
    adj = adj.at[dst, src].add(edge_weight)
    deg = jnp.sum(adj, axis=1)
    deg_inv_sqrt = jnp.where(deg > 0, jax.lax.rsqrt(jnp.maximum(deg, 1e-12)), 0.0)
    return -(deg_inv_sqrt[:, None] * adj * deg_inv_sqrt[None, :])


def chebnet_reference(l_hat, x, params):
    """f32 reference with the original association, for a numerics sanity check."""
    h = (x @ params["w1"][0] + (l_hat @ x) @ params["w1"][1] + params["b1"])
    h = jnp.maximum(h, 0.0)
    z = (h @ params["w2"][0] + (l_hat @ h) @ params["w2"][1] + params["b2"])
    return jax.nn.log_softmax(z, axis=1)


def glorot(key, shape):
    fan_in, fan_out = shape[-2], shape[-1]
    limit = jnp.sqrt(6.0 / (fan_in + fan_out))
    return jax.random.uniform(key, shape, jnp.float32, -limit, limit)


def init_params(key, num_features, hidden, num_classes, K=2):
    k1, k2 = jax.random.split(key)
    return {
        "w1": glorot(k1, (K, num_features, hidden)),
        "b1": jnp.zeros((hidden,), jnp.float32),
        "w2": glorot(k2, (K, hidden, num_classes)),
        "b2": jnp.zeros((num_classes,), jnp.float32),
    }


if __name__ == "__main__":
    key = jax.random.PRNGKey(0)
    kx, kw, ke = jax.random.split(key, 3)

    num_nodes = 64
    num_features = 16
    hidden = 16
    num_classes = 8

    # Node features.
    x = jax.random.normal(kx, (num_nodes, num_features), jnp.float32)

    # Simple undirected ring graph with positive symmetric weights.
    src = jnp.arange(num_nodes, dtype=jnp.int32)
    dst = (src + 1) % num_nodes
    edge_index = jnp.concatenate(
        [jnp.stack([src, dst]), jnp.stack([dst, src])], axis=1)     # (2, 2N)
    ew = jax.random.uniform(ke, (num_nodes,), jnp.float32, 0.5, 1.5)
    edge_weight = jnp.concatenate([ew, ew])

    l_hat = build_scaled_laplacian(edge_index, edge_weight, num_nodes)
    params = init_params(kw, num_features, hidden, num_classes, K=2)

    out = chebnet_forward(l_hat, x, params)
    out = jax.block_until_ready(out)

    ref = chebnet_reference(l_hat, x, params)

    assert out.shape == (num_nodes, num_classes)
    row_sums = jnp.exp(out).sum(axis=1)
    assert jnp.allclose(row_sums, 1.0, atol=1e-3)
    max_err = float(jnp.max(jnp.abs(out - ref)))
    assert max_err < 0.1, f"mismatch vs f32 reference: {max_err}"

    print("KERNEL_OK")
</pallas_src>

<mosaic_0001>
module attributes {stable_mosaic.version = 11 : i64} {
  func.func @_proj_kernel(%arg0: i32, %arg1: memref<64x16xbf16, #tpu.memory_space<vmem>>, %arg2: memref<16x256xbf16, #tpu.memory_space<vmem>>, %arg3: memref<64x128xf32, #tpu.memory_space<vmem>>, %arg4: memref<64x128xbf16, #tpu.memory_space<vmem>>) attributes {dimension_semantics = [#tpu.dimension_semantics<parallel>], iteration_bounds = array<i64: 1>, scalar_prefetch = 0 : i64, scratch_operands = 0 : i64, tpu.core_type = #tpu.core_type<tc>, window_params = [{transform_indices = @transform_0, window_bounds = array<i64: 64, 16>}, {pipeline_mode = #tpu.pipeline_mode<synchronous>, transform_indices = @transform_1, window_bounds = array<i64: 16, 256>}, {transform_indices = @transform_2, window_bounds = array<i64: 64, 128>}, {transform_indices = @transform_3, window_bounds = array<i64: 64, 128>}]} {
    %c0 = arith.constant 0 : index
    %c0_0 = arith.constant 0 : index
    %0 = vector.load %arg1[%c0, %c0_0] : memref<64x16xbf16, #tpu.memory_space<vmem>>, vector<64x16xbf16>
    %c0_1 = arith.constant 0 : index
    %c0_2 = arith.constant 0 : index
    %1 = vector.load %arg2[%c0_1, %c0_2] : memref<16x256xbf16, #tpu.memory_space<vmem>>, vector<16x256xbf16>
    %cst = arith.constant dense<0.000000e+00> : vector<64x256xf32>
    %2 = tpu.matmul %0, %1, %cst {dimension_numbers = #tpu.dot_dimension_numbers<[1], [0], [0], [1], [0, 0, 1, 1], [], []>} : vector<64x16xbf16>, vector<16x256xbf16>, vector<64x256xf32> -> vector<64x256xf32>
    %3 = vector.extract_strided_slice %2 {offsets = [0, 0], sizes = [64, 128], strides = [1, 1]} : vector<64x256xf32> to vector<64x128xf32>
    %c0_3 = arith.constant 0 : index
    %c0_4 = arith.constant 0 : index
    %4 = vector.load %arg3[%c0_3, %c0_4] : memref<64x128xf32, #tpu.memory_space<vmem>>, vector<64x128xf32>
    tpu.vector_store %arg3[%c0_3, %c0_4], %3 {strides = array<i32>} : memref<64x128xf32, #tpu.memory_space<vmem>>, vector<64x128xf32>,
    %5 = vector.extract_strided_slice %2 {offsets = [0, 128], sizes = [64, 128], strides = [1, 1]} : vector<64x256xf32> to vector<64x128xf32>
    %6 = arith.truncf %5 : vector<64x128xf32> to vector<64x128xbf16>
    %c0_5 = arith.constant 0 : index
    %c0_6 = arith.constant 0 : index
    %7 = vector.load %arg4[%c0_5, %c0_6] : memref<64x128xbf16, #tpu.memory_space<vmem>>, vector<64x128xbf16>
    tpu.vector_store %arg4[%c0_5, %c0_6], %6 {strides = array<i32>} : memref<64x128xbf16, #tpu.memory_space<vmem>>, vector<64x128xbf16>,
    return
  }
  func.func @transform_0(%arg0: i32) -> (i32, i32) {
    %c0_i32 = arith.constant 0 : i32
    %c0_i32_0 = arith.constant 0 : i32
    return %arg0, %c0_i32 : i32, i32
  }
  func.func @transform_1(%arg0: i32) -> (i32, i32) {
    %c0_i32 = arith.constant 0 : i32
    %c0_i32_0 = arith.constant 0 : i32
    %c0_i32_1 = arith.constant 0 : i32
    return %c0_i32, %c0_i32_0 : i32, i32
  }
  func.func @transform_2(%arg0: i32) -> (i32, i32) {
    %c0_i32 = arith.constant 0 : i32
    %c0_i32_0 = arith.constant 0 : i32
    return %arg0, %c0_i32 : i32, i32
  }
  func.func @transform_3(%arg0: i32) -> (i32, i32) {
    %c0_i32 = arith.constant 0 : i32
    %c0_i32_0 = arith.constant 0 : i32
    return %arg0, %c0_i32 : i32, i32
  }
}

</mosaic_0001>

<bundles_post_ra>
// kernel: tpu_custom_call.1
= control target key start
LH: loop header
LB: loop body
LE: loop exit
PB: predicated region body
PF: predicated region fallthrough
CT: control target
= control target key end

     0   :  { %9 = vsyncpa [#allocation3], 0  ;;  %v331_v2 = vmov 0   ;;  %vm56_vm0 = vcmask 130048   ;;  %s389_s0 = inlined_call_operand.vmem [shape: bf16[64,16], index: 0, kind: input, shape index: {}]   ;;  %s390_s1 = inlined_call_operand.vmem [shape: bf16[16,256], index: 1, kind: input, shape index: {}]   ;;  %s391_s2 = inlined_call_operand.hbm [shape: f32[64,128], index: 2, kind: output, shape index: {0}]   ;;  %s392_s3 = inlined_call_operand.hbm [shape: bf16[64,128], index: 3, kind: output, shape index: {1}]  }
   0x1   :  { %v280_v0 = vld [vmem:[%s390_s1 + $0x4] ss:$8 sps:$4 sm:$0xff]   ;;  %v282_v1 = vld [vmem:[%s390_s1] ss:$8 sps:$4 sm:$0xff]   ;;  %101 = vmatprep.mubr.bf16.mxu0 %v331_v2  ;;  %121 = vmatprep.mubr.bf16.mxu1 %v331_v2  ;;  %v284_v4 = vld [vmem:[%s389_s0 + $0x10] sm:$0xff]  }
   0x2   :  { %83 = vmatprep.subr.bf16.mxu0 %v280_v0  ;;  %271 = vmatprep.subr.bf16.mxu1 %v280_v0  ;;  %v283_v3 = vld [vmem:[%s389_s0] sm:$0xff]  }
   0x3   :  { %84 = vmatpush1.bf16.msra.mxu0 %v282_v1  ;;  %272 = vmatpush1.bf16.msra.mxu1 %v282_v1 }
   0x4   :  { %10 = vsyncpa [#allocation5], 0  ;;  %v285_v5 = vld [vmem:[%s389_s0 + $0x8] sm:$0xff]   ;;  %v286_v6 = vld [vmem:[%s389_s0 + $0x18] sm:$0xff]   ;;  %s332_s23 = smov [#allocation2]   ;;  %s333_s0 = smov [#allocation4]  }
   0x5   :  { %s195_s24 = sshll.u32 %s332_s23, 4  ;;  %s207_s25 = sshll.u32 %s333_s0, 4  ;;  %s196_s24 = int_to_ptr.vmem [resolvable:$true] %s195_s24  ;;  %s376_s25 = int_to_ptr.vmem [resolvable:$true] %s207_s25 }
   0x6   :  { %228 = vmatmul.mubr.msk.bf16.vlgmr.msra.gmra.mxu0 %vm56_vm0, %v283_v3  ;;  %230 = vmatmul.mubr.msk.bf16.vlgmr.msra.gmra.mxu1 %vm56_vm0, %v284_v4  ;;  %s287_s26 = scalar_lea.vmem %s196_s24, 1024  ;;  %p292_p1 = scmp.lt.s32.totalorder %s196_s24, %s196_s24 }
   0x7   :  { %111 = vmatprep.mubr.bf16.mxu0 %v331_v2  ;;  %131 = vmatprep.mubr.bf16.mxu1 %v331_v2  ;;  %p288_p0 = scmp.ne.s32.totalorder %s196_s24, %s287_s26  ;;  %p293_p2 = scmp.lt.s32.totalorder %s287_s26, %s287_s26 }
   0x9   :  { %p294_p3 = por %p293_p2, %p292_p1 }
   0xb   :  { %p295_p4 = pnand %p294_p3, %p288_p0 }
   0xe   :  { %229 = vmatmul.mubr.msk.bf16.gmra.mxu0 %vm56_vm0, %v285_v5  ;;  %231 = vmatmul.mubr.msk.bf16.gmra.mxu1 %vm56_vm0, %v286_v6 }
  0xc6   :  { %v103_v7 = vpop.f32.mrf.mxu0  ;;  %v123_v8 = vpop.f32.mrf.mxu1 }
  0xc7   :  { %142 = vst [vmem:[#allocation2] sm:$0xff] %v103_v7  ;;  %146 = vst [vmem:[#allocation2 + $0x20] sm:$0xff] %v123_v8 }
  0xc8   :  { %v105_v9 = vpop.f32.mrf.mxu0  ;;  %v125_v10 = vpop.f32.mrf.mxu1 }
  0xca   :  { %v107_v11 = vpop.f32.mrf.mxu0  ;;  %v127_v12 = vpop.f32.mrf.mxu1 }
  0xcb   :  { %143 = vst [vmem:[#allocation2 + $0x8] sm:$0xff] %v107_v11  ;;  %147 = vst [vmem:[#allocation2 + $0x28] sm:$0xff] %v127_v12 }
  0xcc   :  { %v109_v13 = vpop.f32.mrf.mxu0  ;;  %v129_v14 = vpop.f32.mrf.mxu1 }
  0xcd   :  { %v251_v15 = vpack.c.bf16 %v109_v13, %v105_v9  ;;  %v261_v16 = vpack.c.bf16 %v129_v14, %v125_v10 }
  0xce   :  { %v113_v17 = vpop.f32.mrf.mxu0  ;;  %v133_v18 = vpop.f32.mrf.mxu1 }
  0xcf   :  { %252 = vst [vmem:[#allocation4] sm:$0xff] %v251_v15   ;;  %269 = vst [vmem:[#allocation4 + $0x10] sm:$0xff] %v261_v16  }
  0xd0   :  { %144 = vst [vmem:[#allocation2 + $0x10] sm:$0xff] %v113_v17  ;;  %148 = vst [vmem:[#allocation2 + $0x30] sm:$0xff] %v133_v18  ;;  %v115_v19 = vpop.f32.mrf.mxu0  ;;  %v135_v20 = vpop.f32.mrf.mxu1 }
  0xd2   :  { %v117_v21 = vpop.f32.mrf.mxu0  ;;  %v137_v22 = vpop.f32.mrf.mxu1 }
  0xd3   :  { %145 = vst [vmem:[#allocation2 + $0x18] sm:$0xff] %v117_v21  ;;  %149 = vst [vmem:[#allocation2 + $0x38] sm:$0xff] %v137_v22 }
  0xd4   :  { %v119_v23 = vpop.f32.mrf.mxu0  ;;  %v139_v24 = vpop.f32.mrf.mxu1 }
  0xd5   :  { %298 = shalt.err (!%p295_p4)
}
  0xd6   :  { %s334_s27 = smov 128   ;;  %s335_s28 = smov 8   ;;  %v256_v25 = vpack.c.bf16 %v119_v23, %v115_v19  ;;  %v266_v26 = vpack.c.bf16 %v139_v24, %v135_v20 }
  0xd7   :  { %201 = dma.vmem_to_hbm [thread:$0]  %s196_s24, 1024, %s391_s2, [#allocation3], %s334_s27, %s334_s27, %s335_s28  }
  0xd8   :  { %268 = vst [vmem:[#allocation4 + $0x8] sm:$0xff] %v256_v25   ;;  %270 = vst [vmem:[#allocation4 + $0x18] sm:$0xff] %v266_v26   ;;  %s307_s4 = scalar_lea.vmem %s376_s25, 512  ;;  %p312_p6 = scmp.lt.s32.totalorder %s376_s25, %s376_s25 }
  0xd9   :  { %p308_p5 = scmp.ne.s32.totalorder %s376_s25, %s307_s4  ;;  %p313_p7 = scmp.lt.s32.totalorder %s307_s4, %s307_s4 }
  0xdb   :  { %p314_p8 = por %p313_p7, %p312_p6 }
  0xdd   :  { %p315_p9 = pnand %p314_p8, %p308_p5 }
  0xdf   :  { %318 = shalt.err (!%p315_p9)
}
  0xe0   :  { %s336_s5 = smov 64   ;;  %s337_s6 = smov 4  }
  0xe1   :  { %213 = dma.vmem_to_hbm [thread:$0]  %s376_s25, 512, %s392_s3, [#allocation5], %s336_s5, %s336_s5, %s337_s6  }
  0xe2   :  { %327 = dma.done.wait [#allocation3], 1024  }
  0xe3   :  { %328 = vsyncadd [#allocation3], 4294966272 }
  0xe4   :  { %329 = dma.done.wait [#allocation5], 512  }
  0xe5   :  { %330 = vsyncadd [#allocation5], 4294966784 }
  0xe6   :  { %220 = vsyncpa [#allocation3], 1 }
  0xe7   :  { %221 = vsyncpa [#allocation5], 1 }

</bundles_post_ra>
